<compile_context>
chip_gen: v7x
topology: tpu7x:2x2x1
jax: 0.10.0
libtpu: 0.0.40
codegen_flags: <defaults>
</compile_context>

<pallas_src>
import jax
import jax.numpy as jnp
from jax import lax
from jax.experimental import pallas as pl
from jax.experimental.pallas import tpu as pltpu

INPUT_DIM = 550
H1, H2, H3 = 256, 64, 128
OUTPUT_DIM = 500
BN_EPS = 1e-5

# Lane-dense padded sizes (multiples of 128).
D_IN_P = 640    # 550 -> 640 (5 full lane tiles)
H2_P = 128      # 64  -> 128
D_OUT_P = 512   # 500 -> 512
GB_W = 512      # packed gamma/beta row width


def _bn_scale_shift(h, gamma, beta, inv_b):
    """Training-mode BatchNorm1d folded into a per-feature scale/shift (f32).

    Single-pass stats: mean = sum/B, var = sum(x^2)/B - mean^2 (biased).
    """
    s1 = jnp.sum(h, axis=0, keepdims=True)
    s2 = jnp.sum(h * h, axis=0, keepdims=True)
    mean = s1 * inv_b
    var = jnp.maximum(s2 * inv_b - mean * mean, 0.0)
    scale = gamma * lax.rsqrt(var + BN_EPS)
    shift = beta - mean * scale
    return scale, shift


def global_dnn_kernel(x_ref, w1_ref, w2_ref, w3_ref, w4_ref, gb_ref, o_ref):
    inv_b = 1.0 / x_ref.shape[0]  # static batch size

    # Block 1: Linear(640->256) [bias exactly cancelled by BN] + BN + ReLU
    h = jnp.dot(x_ref[...].astype(jnp.bfloat16), w1_ref[...],
                preferred_element_type=jnp.float32)
    s, t = _bn_scale_shift(h, gb_ref[0:1, 0:H1], gb_ref[1:2, 0:H1], inv_b)
    h = jnp.maximum(h * s + t, 0.0)

    # Block 2: Linear(256->128 padded) + BN + ReLU
    h = jnp.dot(h.astype(jnp.bfloat16), w2_ref[...],
                preferred_element_type=jnp.float32)
    s, t = _bn_scale_shift(h, gb_ref[2:3, 0:H2_P], gb_ref[3:4, 0:H2_P], inv_b)
    h = jnp.maximum(h * s + t, 0.0)

    # Block 3: Linear(128->128) + BN + ReLU
    h = jnp.dot(h.astype(jnp.bfloat16), w3_ref[...],
                preferred_element_type=jnp.float32)
    s, t = _bn_scale_shift(h, gb_ref[4:5, 0:H3], gb_ref[5:6, 0:H3], inv_b)
    h = jnp.maximum(h * s + t, 0.0)

    # Block 4: Linear(128->512 padded) + BN + Sigmoid
    h = jnp.dot(h.astype(jnp.bfloat16), w4_ref[...],
                preferred_element_type=jnp.float32)
    s, t = _bn_scale_shift(h, gb_ref[6:7, 0:D_OUT_P], gb_ref[7:8, 0:D_OUT_P], inv_b)
    o_ref[...] = jax.nn.sigmoid(h * s + t)


def prepare_params(params):
    """One-time pack of PyTorch-layout params into the kernel layout.

    Returns (w1p, w2p, w3p, w4p, gb):
      * weights (already (in, out)) zero-padded to lane-dense shapes, cast bf16;
      * gamma/beta of the 4 BN layers packed into one (8, 512) f32 buffer
        (gamma rows padded with 1, beta rows padded with 0);
      * Linear biases dropped (exactly cancelled by training-mode BN).
    """
    (w1, _b1, g1, be1, w2, _b2, g2, be2,
     w3, _b3, g3, be3, w4, _b4, g4, be4) = params

    w1p = jnp.pad(w1, ((0, D_IN_P - INPUT_DIM), (0, 0))).astype(jnp.bfloat16)
    w2p = jnp.pad(w2, ((0, 0), (0, H2_P - H2))).astype(jnp.bfloat16)
    w3p = jnp.pad(w3, ((0, H2_P - H2), (0, 0))).astype(jnp.bfloat16)
    w4p = jnp.pad(w4, ((0, 0), (0, D_OUT_P - OUTPUT_DIM))).astype(jnp.bfloat16)

    rows = []
    for g, be in ((g1, be1), (g2, be2), (g3, be3), (g4, be4)):
        g = g.reshape(1, -1).astype(jnp.float32)
        be = be.reshape(1, -1).astype(jnp.float32)
        rows.append(jnp.pad(g, ((0, 0), (0, GB_W - g.shape[1])), constant_values=1.0))
        rows.append(jnp.pad(be, ((0, 0), (0, GB_W - be.shape[1])), constant_values=0.0))
    gb = jnp.concatenate(rows, axis=0)  # (8, 512) f32
    return w1p, w2p, w3p, w4p, gb


def global_dnn_9lifi_forward(x, packed):
    """x: (B, 550) f32.  packed: output of prepare_params."""
    w1p, w2p, w3p, w4p, gb = packed
    batch = x.shape[0]
    xp = jnp.pad(x, ((0, 0), (0, D_IN_P - INPUT_DIM)))  # lane-dense input (B, 640)

    flops = 2 * batch * (D_IN_P * H1 + H1 * H2_P + H2_P * H3 + H3 * D_OUT_P)
    bytes_accessed = (
        2 * (w1p.size + w2p.size + w3p.size + w4p.size)      # bf16 weights
        + 4 * gb.size                                        # packed gamma/beta
        + 4 * batch * (D_IN_P + D_OUT_P))                    # x in, out
    transcendentals = 2 * batch * D_OUT_P + (H1 + H2_P + H3 + D_OUT_P)

    vmem = pl.BlockSpec(memory_space=pltpu.MemorySpace.VMEM)
    out = pl.pallas_call(
        global_dnn_kernel,
        out_shape=jax.ShapeDtypeStruct((batch, D_OUT_P), jnp.float32),
        in_specs=[vmem] * 6,
        out_specs=vmem,
        cost_estimate=pl.CostEstimate(
            flops=flops,
            transcendentals=transcendentals,
            bytes_accessed=bytes_accessed),
    )(xp, w1p, w2p, w3p, w4p, gb)
    return out[:, :OUTPUT_DIM]


def _reference(x, params, *, mxu_precision):
    """JAX reference with PyTorch training-mode semantics (biases included).

    mxu_precision=True mirrors the kernel's matmul policy (bf16 inputs,
    f32 accumulate); False runs fully in f32.
    """
    (w1, b1, g1, be1, w2, b2, g2, be2,
     w3, b3, g3, be3, w4, b4, g4, be4) = params

    def lin(h, w, b):
        if mxu_precision:
            h = h.astype(jnp.bfloat16)
            w = w.astype(jnp.bfloat16)
        return jnp.dot(h, w, preferred_element_type=jnp.float32) + b

    def bn(h, g, b):
        m = jnp.mean(h, axis=0, keepdims=True)
        v = jnp.mean((h - m) ** 2, axis=0, keepdims=True)
        return g * (h - m) / jnp.sqrt(v + BN_EPS) + b

    h = jnp.maximum(bn(lin(x, w1, b1), g1, be1), 0.0)
    h = jnp.maximum(bn(lin(h, w2, b2), g2, be2), 0.0)
    h = jnp.maximum(bn(lin(h, w3, b3), g3, be3), 0.0)
    return jax.nn.sigmoid(bn(lin(h, w4, b4), g4, be4))


def init_params(key):
    """Deterministic synthetic parameters.  Linear weights stored as (in, out)."""
    dims = [(INPUT_DIM, H1), (H1, H2), (H2, H3), (H3, OUTPUT_DIM)]
    params = []
    for fan_in, fan_out in dims:
        key, kw, kb, kg, kbe = jax.random.split(key, 5)
        bound = 1.0 / jnp.sqrt(fan_in)
        w = jax.random.uniform(kw, (fan_in, fan_out), jnp.float32, -bound, bound)
        b = jax.random.uniform(kb, (1, fan_out), jnp.float32, -bound, bound)
        gamma = 1.0 + 0.1 * jax.random.normal(kg, (1, fan_out), jnp.float32)
        beta = 0.1 * jax.random.normal(kbe, (1, fan_out), jnp.float32)
        params += [w, b, gamma, beta]
    return params


if __name__ == "__main__":
    key = jax.random.PRNGKey(0)
    kx, kp = jax.random.split(key)

    batch = 8  # one sublane tile; feature dims fixed by the module (550 -> 500)
    x = jax.random.normal(kx, (batch, INPUT_DIM), jnp.float32)
    params = init_params(kp)
    packed = prepare_params(params)

    out = global_dnn_9lifi_forward(x, packed)
    out = jax.block_until_ready(out)
    assert out.shape == (batch, OUTPUT_DIM)
    assert bool(jnp.all(jnp.isfinite(out)))

    # Strict check vs a reference that mirrors the kernel's MXU precision policy
    # (bf16 matmul inputs, f32 accumulate) but STILL includes the Linear biases,
    # validating the bias-cancellation, BN fusion and padding/packing exactly.
    ref_mirror = _reference(x, params, mxu_precision=True)
    assert jnp.allclose(out, ref_mirror, atol=1e-3, rtol=1e-3), \
        "mismatch vs precision-mirrored reference"

    # Loose check vs the pure-f32 PyTorch-semantics reference (bf16 matmul
    # rounding is the only difference; sigmoid outputs differ by O(1e-3)).
    ref_f32 = _reference(x, params, mxu_precision=False)
    assert jnp.allclose(out, ref_f32, atol=5e-2), "mismatch vs f32 reference"

    print("KERNEL_OK")
</pallas_src>

<mosaic_0001>
module attributes {stable_mosaic.version = 11 : i64} {
  func.func @global_dnn_kernel(%arg0: memref<8x640xf32, #tpu.memory_space<vmem>>, %arg1: memref<640x256xbf16, #tpu.memory_space<vmem>>, %arg2: memref<256x128xbf16, #tpu.memory_space<vmem>>, %arg3: memref<128x128xbf16, #tpu.memory_space<vmem>>, %arg4: memref<128x512xbf16, #tpu.memory_space<vmem>>, %arg5: memref<8x512xf32, #tpu.memory_space<vmem>>, %arg6: memref<8x512xf32, #tpu.memory_space<vmem>>) attributes {dimension_semantics = [], scalar_prefetch = 0 : i64, scratch_operands = 0 : i64, tpu.core_type = #tpu.core_type<tc>} {
    %c0 = arith.constant 0 : index
    %c0_0 = arith.constant 0 : index
    %0 = vector.load %arg0[%c0, %c0_0] : memref<8x640xf32, #tpu.memory_space<vmem>>, vector<8x640xf32>
    %1 = arith.truncf %0 : vector<8x640xf32> to vector<8x640xbf16>
    %c0_1 = arith.constant 0 : index
    %c0_2 = arith.constant 0 : index
    %2 = vector.load %arg1[%c0_1, %c0_2] : memref<640x256xbf16, #tpu.memory_space<vmem>>, vector<640x256xbf16>
    %cst = arith.constant dense<0.000000e+00> : vector<8x256xf32>
    %3 = tpu.matmul %1, %2, %cst {dimension_numbers = #tpu.dot_dimension_numbers<[1], [0], [0], [1], [0, 0, 1, 1], [], []>} : vector<8x640xbf16>, vector<640x256xbf16>, vector<8x256xf32> -> vector<8x256xf32>
    %c0_3 = arith.constant 0 : index
    %c0_4 = arith.constant 0 : index
    %4 = vector.load %arg5[%c0_3, %c0_4] : memref<8x512xf32, #tpu.memory_space<vmem>>, vector<1x256xf32>
    %c1 = arith.constant 1 : index
    %c0_5 = arith.constant 0 : index
    %5 = vector.load %arg5[%c1, %c0_5] : memref<8x512xf32, #tpu.memory_space<vmem>>, vector<1x256xf32>
    %cst_6 = arith.constant dense<0.000000e+00> : vector<256xf32>
    %6 = vector.multi_reduction <add>, %3, %cst_6 [0] : vector<8x256xf32> to vector<256xf32>
    %7 = vector.shape_cast %6 : vector<256xf32> to vector<1x256xf32>
    %8 = arith.mulf %3, %3 : vector<8x256xf32>
    %cst_7 = arith.constant dense<0.000000e+00> : vector<256xf32>
    %9 = vector.multi_reduction <add>, %8, %cst_7 [0] : vector<8x256xf32> to vector<256xf32>
    %10 = vector.shape_cast %9 : vector<256xf32> to vector<1x256xf32>
    %cst_8 = arith.constant 1.250000e-01 : f32
    %11 = vector.broadcast %cst_8 : f32 to vector<1x256xf32>
    %12 = arith.mulf %7, %11 : vector<1x256xf32>
    %cst_9 = arith.constant 1.250000e-01 : f32
    %13 = vector.broadcast %cst_9 : f32 to vector<1x256xf32>
    %14 = arith.mulf %10, %13 : vector<1x256xf32>
    %15 = arith.mulf %12, %12 : vector<1x256xf32>
    %16 = arith.subf %14, %15 : vector<1x256xf32>
    %cst_10 = arith.constant 0.000000e+00 : f32
    %17 = vector.broadcast %cst_10 : f32 to vector<1x256xf32>
    %18 = arith.maximumf %16, %17 : vector<1x256xf32>
    %cst_11 = arith.constant 9.99999974E-6 : f32
    %19 = vector.broadcast %cst_11 : f32 to vector<1x256xf32>
    %20 = arith.addf %18, %19 : vector<1x256xf32>
    %21 = math.rsqrt %20 : vector<1x256xf32>
    %22 = arith.mulf %4, %21 : vector<1x256xf32>
    %23 = arith.mulf %12, %22 : vector<1x256xf32>
    %24 = arith.subf %5, %23 : vector<1x256xf32>
    %25 = vector.broadcast %22 : vector<1x256xf32> to vector<8x256xf32>
    %26 = arith.mulf %3, %25 : vector<8x256xf32>
    %27 = vector.broadcast %24 : vector<1x256xf32> to vector<8x256xf32>
    %28 = arith.addf %26, %27 : vector<8x256xf32>
    %cst_12 = arith.constant 0.000000e+00 : f32
    %29 = vector.broadcast %cst_12 : f32 to vector<8x256xf32>
    %30 = arith.maximumf %28, %29 : vector<8x256xf32>
    %31 = arith.truncf %30 : vector<8x256xf32> to vector<8x256xbf16>
    %c0_13 = arith.constant 0 : index
    %c0_14 = arith.constant 0 : index
    %32 = vector.load %arg2[%c0_13, %c0_14] : memref<256x128xbf16, #tpu.memory_space<vmem>>, vector<256x128xbf16>
    %cst_15 = arith.constant dense<0.000000e+00> : vector<8x128xf32>
    %33 = tpu.matmul %31, %32, %cst_15 {dimension_numbers = #tpu.dot_dimension_numbers<[1], [0], [0], [1], [0, 0, 1, 1], [], []>} : vector<8x256xbf16>, vector<256x128xbf16>, vector<8x128xf32> -> vector<8x128xf32>
    %c2 = arith.constant 2 : index
    %c0_16 = arith.constant 0 : index
    %34 = vector.load %arg5[%c2, %c0_16] : memref<8x512xf32, #tpu.memory_space<vmem>>, vector<1x128xf32>
    %c3 = arith.constant 3 : index
    %c0_17 = arith.constant 0 : index
    %35 = vector.load %arg5[%c3, %c0_17] : memref<8x512xf32, #tpu.memory_space<vmem>>, vector<1x128xf32>
    %cst_18 = arith.constant dense<0.000000e+00> : vector<128xf32>
    %36 = vector.multi_reduction <add>, %33, %cst_18 [0] : vector<8x128xf32> to vector<128xf32>
    %37 = vector.shape_cast %36 : vector<128xf32> to vector<1x128xf32>
    %38 = arith.mulf %33, %33 : vector<8x128xf32>
    %cst_19 = arith.constant dense<0.000000e+00> : vector<128xf32>
    %39 = vector.multi_reduction <add>, %38, %cst_19 [0] : vector<8x128xf32> to vector<128xf32>
    %40 = vector.shape_cast %39 : vector<128xf32> to vector<1x128xf32>
    %cst_20 = arith.constant 1.250000e-01 : f32
    %41 = vector.broadcast %cst_20 : f32 to vector<1x128xf32>
    %42 = arith.mulf %37, %41 : vector<1x128xf32>
    %cst_21 = arith.constant 1.250000e-01 : f32
    %43 = vector.broadcast %cst_21 : f32 to vector<1x128xf32>
    %44 = arith.mulf %40, %43 : vector<1x128xf32>
    %45 = arith.mulf %42, %42 : vector<1x128xf32>
    %46 = arith.subf %44, %45 : vector<1x128xf32>
    %cst_22 = arith.constant 0.000000e+00 : f32
    %47 = vector.broadcast %cst_22 : f32 to vector<1x128xf32>
    %48 = arith.maximumf %46, %47 : vector<1x128xf32>
    %cst_23 = arith.constant 9.99999974E-6 : f32
    %49 = vector.broadcast %cst_23 : f32 to vector<1x128xf32>
    %50 = arith.addf %48, %49 : vector<1x128xf32>
    %51 = math.rsqrt %50 : vector<1x128xf32>
    %52 = arith.mulf %34, %51 : vector<1x128xf32>
    %53 = arith.mulf %42, %52 : vector<1x128xf32>
    %54 = arith.subf %35, %53 : vector<1x128xf32>
    %55 = vector.broadcast %52 : vector<1x128xf32> to vector<8x128xf32>
    %56 = arith.mulf %33, %55 : vector<8x128xf32>
    %57 = vector.broadcast %54 : vector<1x128xf32> to vector<8x128xf32>
    %58 = arith.addf %56, %57 : vector<8x128xf32>
    %cst_24 = arith.constant 0.000000e+00 : f32
    %59 = vector.broadcast %cst_24 : f32 to vector<8x128xf32>
    %60 = arith.maximumf %58, %59 : vector<8x128xf32>
    %61 = arith.truncf %60 : vector<8x128xf32> to vector<8x128xbf16>
    %c0_25 = arith.constant 0 : index
    %c0_26 = arith.constant 0 : index
    %62 = vector.load %arg3[%c0_25, %c0_26] : memref<128x128xbf16, #tpu.memory_space<vmem>>, vector<128x128xbf16>
    %cst_27 = arith.constant dense<0.000000e+00> : vector<8x128xf32>
    %63 = tpu.matmul %61, %62, %cst_27 {dimension_numbers = #tpu.dot_dimension_numbers<[1], [0], [0], [1], [0, 0, 1, 1], [], []>} : vector<8x128xbf16>, vector<128x128xbf16>, vector<8x128xf32> -> vector<8x128xf32>
    %c4 = arith.constant 4 : index
    %c0_28 = arith.constant 0 : index
    %64 = vector.load %arg5[%c4, %c0_28] : memref<8x512xf32, #tpu.memory_space<vmem>>, vector<1x128xf32>
    %c5 = arith.constant 5 : index
    %c0_29 = arith.constant 0 : index
    %65 = vector.load %arg5[%c5, %c0_29] : memref<8x512xf32, #tpu.memory_space<vmem>>, vector<1x128xf32>
    %cst_30 = arith.constant dense<0.000000e+00> : vector<128xf32>
    %66 = vector.multi_reduction <add>, %63, %cst_30 [0] : vector<8x128xf32> to vector<128xf32>
    %67 = vector.shape_cast %66 : vector<128xf32> to vector<1x128xf32>
    %68 = arith.mulf %63, %63 : vector<8x128xf32>
    %cst_31 = arith.constant dense<0.000000e+00> : vector<128xf32>
    %69 = vector.multi_reduction <add>, %68, %cst_31 [0] : vector<8x128xf32> to vector<128xf32>
    %70 = vector.shape_cast %69 : vector<128xf32> to vector<1x128xf32>
    %cst_32 = arith.constant 1.250000e-01 : f32
    %71 = vector.broadcast %cst_32 : f32 to vector<1x128xf32>
    %72 = arith.mulf %67, %71 : vector<1x128xf32>
    %cst_33 = arith.constant 1.250000e-01 : f32
    %73 = vector.broadcast %cst_33 : f32 to vector<1x128xf32>
    %74 = arith.mulf %70, %73 : vector<1x128xf32>
    %75 = arith.mulf %72, %72 : vector<1x128xf32>
    %76 = arith.subf %74, %75 : vector<1x128xf32>
    %cst_34 = arith.constant 0.000000e+00 : f32
    %77 = vector.broadcast %cst_34 : f32 to vector<1x128xf32>
    %78 = arith.maximumf %76, %77 : vector<1x128xf32>
    %cst_35 = arith.constant 9.99999974E-6 : f32
    %79 = vector.broadcast %cst_35 : f32 to vector<1x128xf32>
    %80 = arith.addf %78, %79 : vector<1x128xf32>
    %81 = math.rsqrt %80 : vector<1x128xf32>
    %82 = arith.mulf %64, %81 : vector<1x128xf32>
    %83 = arith.mulf %72, %82 : vector<1x128xf32>
    %84 = arith.subf %65, %83 : vector<1x128xf32>
    %85 = vector.broadcast %82 : vector<1x128xf32> to vector<8x128xf32>
    %86 = arith.mulf %63, %85 : vector<8x128xf32>
    %87 = vector.broadcast %84 : vector<1x128xf32> to vector<8x128xf32>
    %88 = arith.addf %86, %87 : vector<8x128xf32>
    %cst_36 = arith.constant 0.000000e+00 : f32
    %89 = vector.broadcast %cst_36 : f32 to vector<8x128xf32>
    %90 = arith.maximumf %88, %89 : vector<8x128xf32>
    %91 = arith.truncf %90 : vector<8x128xf32> to vector<8x128xbf16>
    %c0_37 = arith.constant 0 : index
    %c0_38 = arith.constant 0 : index
    %92 = vector.load %arg4[%c0_37, %c0_38] : memref<128x512xbf16, #tpu.memory_space<vmem>>, vector<128x512xbf16>
    %cst_39 = arith.constant dense<0.000000e+00> : vector<8x512xf32>
    %93 = tpu.matmul %91, %92, %cst_39 {dimension_numbers = #tpu.dot_dimension_numbers<[1], [0], [0], [1], [0, 0, 1, 1], [], []>} : vector<8x128xbf16>, vector<128x512xbf16>, vector<8x512xf32> -> vector<8x512xf32>
    %c6 = arith.constant 6 : index
    %c0_40 = arith.constant 0 : index
    %94 = vector.load %arg5[%c6, %c0_40] : memref<8x512xf32, #tpu.memory_space<vmem>>, vector<1x512xf32>
    %c7 = arith.constant 7 : index
    %c0_41 = arith.constant 0 : index
    %95 = vector.load %arg5[%c7, %c0_41] : memref<8x512xf32, #tpu.memory_space<vmem>>, vector<1x512xf32>
    %cst_42 = arith.constant dense<0.000000e+00> : vector<512xf32>
    %96 = vector.multi_reduction <add>, %93, %cst_42 [0] : vector<8x512xf32> to vector<512xf32>
    %97 = vector.shape_cast %96 : vector<512xf32> to vector<1x512xf32>
    %98 = arith.mulf %93, %93 : vector<8x512xf32>
    %cst_43 = arith.constant dense<0.000000e+00> : vector<512xf32>
    %99 = vector.multi_reduction <add>, %98, %cst_43 [0] : vector<8x512xf32> to vector<512xf32>
    %100 = vector.shape_cast %99 : vector<512xf32> to vector<1x512xf32>
    %cst_44 = arith.constant 1.250000e-01 : f32
    %101 = vector.broadcast %cst_44 : f32 to vector<1x512xf32>
    %102 = arith.mulf %97, %101 : vector<1x512xf32>
    %cst_45 = arith.constant 1.250000e-01 : f32
    %103 = vector.broadcast %cst_45 : f32 to vector<1x512xf32>
    %104 = arith.mulf %100, %103 : vector<1x512xf32>
    %105 = arith.mulf %102, %102 : vector<1x512xf32>
    %106 = arith.subf %104, %105 : vector<1x512xf32>
    %cst_46 = arith.constant 0.000000e+00 : f32
    %107 = vector.broadcast %cst_46 : f32 to vector<1x512xf32>
    %108 = arith.maximumf %106, %107 : vector<1x512xf32>
    %cst_47 = arith.constant 9.99999974E-6 : f32
    %109 = vector.broadcast %cst_47 : f32 to vector<1x512xf32>
    %110 = arith.addf %108, %109 : vector<1x512xf32>
    %111 = math.rsqrt %110 : vector<1x512xf32>
    %112 = arith.mulf %94, %111 : vector<1x512xf32>
    %113 = arith.mulf %102, %112 : vector<1x512xf32>
    %114 = arith.subf %95, %113 : vector<1x512xf32>
    %115 = vector.broadcast %112 : vector<1x512xf32> to vector<8x512xf32>
    %116 = arith.mulf %93, %115 : vector<8x512xf32>
    %117 = vector.broadcast %114 : vector<1x512xf32> to vector<8x512xf32>
    %118 = arith.addf %116, %117 : vector<8x512xf32>
    %119 = arith.negf %118 : vector<8x512xf32>
    %120 = math.exp %119 : vector<8x512xf32>
    %cst_48 = arith.constant 1.000000e+00 : f32
    %121 = vector.broadcast %cst_48 : f32 to vector<8x512xf32>
    %122 = arith.addf %121, %120 : vector<8x512xf32>
    %123 = arith.divf %121, %122 : vector<8x512xf32>
    %c0_49 = arith.constant 0 : index
    %c0_50 = arith.constant 0 : index
    %124 = vector.load %arg6[%c0_49, %c0_50] : memref<8x512xf32, #tpu.memory_space<vmem>>, vector<8x512xf32>
    tpu.vector_store %arg6[%c0_49, %c0_50], %123 {strides = array<i32>} : memref<8x512xf32, #tpu.memory_space<vmem>>, vector<8x512xf32>,
    return
  }
}

</mosaic_0001>

<bundles_post_ra>
// kernel: tpu_custom_call.1
= control target key start
LH: loop header
LB: loop body
LE: loop exit
PB: predicated region body
PF: predicated region fallthrough
CT: control target
= control target key end

     0   :  { %11 = vsyncpa [#allocation3], 0  ;;  %s2502_s0 = inlined_call_operand.hbm [shape: f32[8,640], index: 0, kind: input, shape index: {}]   ;;  %s2503_s1 = inlined_call_operand.hbm [shape: bf16[640,256], index: 1, kind: input, shape index: {}]   ;;  %s2504_s2 = inlined_call_operand.hbm [shape: bf16[256,128], index: 2, kind: input, shape index: {}]   ;;  %s2505_s3 = inlined_call_operand.hbm [shape: bf16[128,128], index: 3, kind: input, shape index: {}]   ;;  %s2506_s4 = inlined_call_operand.hbm [shape: bf16[128,512], index: 4, kind: input, shape index: {}]   ;;  %s2507_s5 = inlined_call_operand.hbm [shape: f32[8,512], index: 5, kind: input, shape index: {}]   ;;  %s2508_s6 = inlined_call_operand.hbm [shape: f32[8,512], index: 6, kind: output, shape index: {}]  }
   0x1   :  { %12 = vsyncpa [#allocation6], 0 }
   0x2   :  { %13 = vsyncpa [#allocation9], 0 }
   0x3   :  { %14 = vsyncpa [#allocation12], 0 }
   0x4   :  { %15 = vsyncpa [#allocation4], 0  ;;  %s2281_s21 = smov [#allocation5]   ;;  %s2117_s25 = scalar_lea.hbm %s2503_s1, 10240 }
   0x5   :  { %s31_s22 = sshll.u32 %s2281_s21, 4  ;;  %p2118_p0 = scmp.ne.s32.totalorder %s2503_s1, %s2117_s25  ;;  %s32_s22 = int_to_ptr.vmem [resolvable:$true] %s31_s22 }
   0x6   :  { %p2121_p1 = scmp.lt.u32.totalorder %s2117_s25, %s2503_s1 }
   0x8   :  { %p2123_p2 = pnand %p2121_p1, %p2118_p0 }
   0xa   :  { %2126 = shalt.err (!%p2123_p2)
}
   0xb   :  { %s2127_s30 = scalar_lea.vmem %s32_s22, 10240  ;;  %p2132_p4 = scmp.lt.s32.totalorder %s32_s22, %s32_s22 }
   0xc   :  { %p2128_p3 = scmp.ne.s32.totalorder %s32_s22, %s2127_s30  ;;  %p2133_p5 = scmp.lt.s32.totalorder %s2127_s30, %s2127_s30 }
   0xe   :  { %p2134_p6 = por %p2133_p5, %p2132_p4 }
  0x10   :  { %p2135_p7 = pnand %p2134_p6, %p2128_p3 }
  0x12   :  { %2138 = shalt.err (!%p2135_p7)
}
  0x13   :  { %s2282_s7 = smov 128   ;;  %s2283_s8 = smov 8  }
  0x14   :  { %37 = dma.hbm_to_vmem [thread:$0]  %s2503_s1, 10240, %s32_s22, [#allocation6], %s2282_s7, %s2282_s7, %s2283_s8  }
  0x15   :  { %s2284_s11 = smov [#allocation8]   ;;  %s2285_s13 = smov [#allocation2]  }
  0x16   :  { %s55_s12 = sshll.u32 %s2284_s11, 4  ;;  %s22_s14 = sshll.u32 %s2285_s13, 4  ;;  %s56_s12 = int_to_ptr.vmem [resolvable:$true] %s55_s12  ;;  %s23_s14 = int_to_ptr.vmem [resolvable:$true] %s22_s14 }
  0x17   :  { %s2139_s17 = scalar_lea.hbm %s2505_s3, 1024 }
  0x18   :  { %p2140_p8 = scmp.ne.s32.totalorder %s2505_s3, %s2139_s17  ;;  %p2143_p9 = scmp.lt.u32.totalorder %s2139_s17, %s2505_s3 }
  0x1a   :  { %p2145_p10 = pnand %p2143_p9, %p2140_p8 }
  0x1c   :  { %2148 = shalt.err (!%p2145_p10)
}
  0x1d   :  { %s2149_s1 = scalar_lea.vmem %s56_s12, 1024  ;;  %p2154_p12 = scmp.lt.s32.totalorder %s56_s12, %s56_s12 }
  0x1e   :  { %p2150_p11 = scmp.ne.s32.totalorder %s56_s12, %s2149_s1  ;;  %p2155_p13 = scmp.lt.s32.totalorder %s2149_s1, %s2149_s1 }
  0x20   :  { %p2156_p0 = por %p2155_p13, %p2154_p12 }
  0x22   :  { %p2157_p1 = pnand %p2156_p0, %p2150_p11 }
  0x24   :  { %2160 = shalt.err (!%p2157_p1)
}
  0x25   :  { %s2286_s22 = smov 64   ;;  %s2287_s23 = smov 4  }
  0x26   :  { %61 = dma.hbm_to_vmem [thread:$0]  %s2505_s3, 1024, %s56_s12, [#allocation9], %s2286_s22, %s2286_s22, %s2287_s23  }
  0x27   :  { %s2161_s28 = scalar_lea.hbm %s2502_s0, 640 }
  0x28   :  { %p2162_p2 = scmp.ne.s32.totalorder %s2502_s0, %s2161_s28  ;;  %p2165_p3 = scmp.lt.u32.totalorder %s2161_s28, %s2502_s0 }
  0x2a   :  { %p2167_p4 = pnand %p2165_p3, %p2162_p2 }
  0x2c   :  { %2170 = shalt.err (!%p2167_p4)
}
  0x2d   :  { %s2171_s9 = scalar_lea.vmem %s23_s14, 640  ;;  %p2176_p6 = scmp.lt.s32.totalorder %s23_s14, %s23_s14 }
  0x2e   :  { %p2172_p5 = scmp.ne.s32.totalorder %s23_s14, %s2171_s9  ;;  %p2177_p7 = scmp.lt.s32.totalorder %s2171_s9, %s2171_s9 }
  0x30   :  { %p2178_p8 = por %p2177_p7, %p2176_p6 }
  0x32   :  { %p2179_p9 = pnand %p2178_p8, %p2172_p5 }
  0x34   :  { %2182 = shalt.err (!%p2179_p9)
}
  0x35   :  { %25 = dma.hbm_to_vmem [thread:$0]  %s2502_s0, 640, %s23_s14, [#allocation3]  }
  0x36   :  { %s2288_s11 = smov [#allocation7]   ;;  %s2289_s13 = smov [#allocation10]  }
  0x37   :  { %s43_s12 = sshll.u32 %s2288_s11, 4  ;;  %s67_s15 = sshll.u32 %s2289_s13, 4  ;;  %s44_s12 = int_to_ptr.vmem [resolvable:$true] %s43_s12  ;;  %s68_s15 = int_to_ptr.vmem [resolvable:$true] %s67_s15 }
  0x38   :  { %s2183_s18 = scalar_lea.hbm %s2504_s2, 2048 }
  0x39   :  { %p2184_p10 = scmp.ne.s32.totalorder %s2504_s2, %s2183_s18  ;;  %p2187_p11 = scmp.lt.u32.totalorder %s2183_s18, %s2504_s2 }
  0x3b   :  { %p2189_p12 = pnand %p2187_p11, %p2184_p10 }
  0x3d   :  { %2192 = shalt.err (!%p2189_p12)
}
  0x3e   :  { %s2193_s0 = scalar_lea.vmem %s44_s12, 2048  ;;  %p2198_p0 = scmp.lt.s32.totalorder %s44_s12, %s44_s12 }
  0x3f   :  { %p2194_p13 = scmp.ne.s32.totalorder %s44_s12, %s2193_s0  ;;  %p2199_p1 = scmp.lt.s32.totalorder %s2193_s0, %s2193_s0 }
  0x41   :  { %p2200_p2 = por %p2199_p1, %p2198_p0 }
  0x43   :  { %p2201_p3 = pnand %p2200_p2, %p2194_p13 }
  0x45   :  { %2204 = shalt.err (!%p2201_p3)
}
  0x46   :  { %49 = dma.hbm_to_vmem [thread:$0]  %s2504_s2, 2048, %s44_s12, [#allocation6], %s2286_s22, %s2286_s22, %s2287_s23  }
  0x47   :  { %s2205_s27 = scalar_lea.hbm %s2506_s4, 4096 }
  0x48   :  { %p2206_p4 = scmp.ne.s32.totalorder %s2506_s4, %s2205_s27  ;;  %p2209_p5 = scmp.lt.u32.totalorder %s2205_s27, %s2506_s4 }
  0x4a   :  { %p2211_p6 = pnand %p2209_p5, %p2206_p4 }
  0x4c   :  { %2214 = shalt.err (!%p2211_p6)
}
  0x4d   :  { %s2215_s8 = scalar_lea.vmem %s68_s15, 4096  ;;  %p2220_p8 = scmp.lt.s32.totalorder %s68_s15, %s68_s15 }
  0x4e   :  { %p2216_p7 = scmp.ne.s32.totalorder %s68_s15, %s2215_s8  ;;  %p2221_p9 = scmp.lt.s32.totalorder %s2215_s8, %s2215_s8 }
  0x50   :  { %p2222_p10 = por %p2221_p9, %p2220_p8 }
  0x52   :  { %p2223_p11 = pnand %p2222_p10, %p2216_p7 }
  0x54   :  { %2226 = shalt.err (!%p2223_p11)
}
  0x55   :  { %s2290_s2 = smov 256   ;;  %s2291_s22 = smov 16  }
  0x56   :  { %73 = dma.hbm_to_vmem [thread:$0]  %s2506_s4, 4096, %s68_s15, [#allocation9], %s2290_s2, %s2290_s2, %s2291_s22  }
  0x57   :  { %s2292_s3 = smov [#allocation11]   ;;  %s2227_s13 = scalar_lea.hbm %s2507_s5, 512 }
  0x58   :  { %s80_s10 = sshll.u32 %s2292_s3, 4  ;;  %p2228_p12 = scmp.ne.s32.totalorder %s2507_s5, %s2227_s13  ;;  %s81_s10 = int_to_ptr.vmem [resolvable:$true] %s80_s10 }
  0x59   :  { %p2231_p13 = scmp.lt.u32.totalorder %s2227_s13, %s2507_s5 }
  0x5b   :  { %p2233_p0 = pnand %p2231_p13, %p2228_p12 }
  0x5d   :  { %2236 = shalt.err (!%p2233_p0)
}
  0x5e   :  { %s2237_s20 = scalar_lea.vmem %s81_s10, 512  ;;  %p2242_p2 = scmp.lt.s32.totalorder %s81_s10, %s81_s10 }
  0x5f   :  { %p2238_p1 = scmp.ne.s32.totalorder %s81_s10, %s2237_s20  ;;  %p2243_p3 = scmp.lt.s32.totalorder %s2237_s20, %s2237_s20 }
  0x61   :  { %p2244_p4 = por %p2243_p3, %p2242_p2 }
  0x63   :  { %p2245_p5 = pnand %p2244_p4, %p2238_p1 }
  0x65   :  { %2248 = shalt.err (!%p2245_p5)
}
  0x66   :  { %83 = dma.hbm_to_vmem [thread:$0]  %s2507_s5, 512, %s81_s10, [#allocation12]  }
  0x67   :  { %2271 = dma.done.wait [#allocation3], 640  }
  0x68   :  { %2272 = vsyncadd [#allocation3], 4294966656 }
  0x69   :  { %2273 = dma.done.wait [#allocation6], 12288  }
  0x6a   :  { %2274 = vsyncadd [#allocation6], 4294955008 }
  0x6b   :  { %2275 = dma.done.wait [#allocation9], 5120  }
  0x6c   :  { %2276 = vsyncadd [#allocation9], 4294962176 }
  0x6d   :  { %2277 = dma.done.wait [#allocation12], 512  }
  0x6e   :  { %2278 = vsyncadd [#allocation12], 4294966784  ;;  %v1893_v0 = vld [vmem:[#allocation5 + $0x4] ss:$8 sps:$4 sm:$0xff]   ;;  %v1895_v1 = vld [vmem:[#allocation5] ss:$8 sps:$4 sm:$0xff]  }
  0x6f   :  { %593 = vmatprep.subr.bf16.mxu0 %v1893_v0  ;;  %v1896_v2 = vld [vmem:[#allocation5 + $0x14] ss:$8 sps:$4 sm:$0xff]   ;;  %v1898_v3 = vld [vmem:[#allocation5 + $0x10] ss:$8 sps:$4 sm:$0xff]   ;;  %v1899_v4 = vld [vmem:[#allocation5 + $0x24] ss:$8 sps:$4 sm:$0xff]  }
  0x70   :  { %594 = vmatpush1.bf16.msra.mxu0 %v1895_v1  ;;  %v1901_v5 = vld [vmem:[#allocation5 + $0x20] ss:$8 sps:$4 sm:$0xff]   ;;  %v1902_v6 = vld [vmem:[#allocation5 + $0x34] ss:$8 sps:$4 sm:$0xff]   ;;  %v1904_v7 = vld [vmem:[#allocation5 + $0x30] ss:$8 sps:$4 sm:$0xff]  }
  0x71   :  { %595 = vmatprep.subr.bf16.mxu0 %v1896_v2  ;;  %v1905_v8 = vld [vmem:[#allocation5 + $0x44] ss:$8 sps:$4 sm:$0xff]   ;;  %v1907_v9 = vld [vmem:[#allocation5 + $0x40] ss:$8 sps:$4 sm:$0xff]   ;;  %v1908_v10 = vld [vmem:[#allocation5 + $0x54] ss:$8 sps:$4 sm:$0xff]  }
  0x72   :  { %v1910_v11 = vld [vmem:[#allocation5 + $0x50] ss:$8 sps:$4 sm:$0xff]   ;;  %v1911_v12 = vld [vmem:[#allocation5 + $0x64] ss:$8 sps:$4 sm:$0xff]   ;;  %v1913_v15 = vld [vmem:[#allocation5 + $0x60] ss:$8 sps:$4 sm:$0xff]  }
  0x73   :  { %v104_v13 = vld [vmem:[#allocation2 + $0x8] sm:$0xff]  ;;  %v1914_v16 = vld [vmem:[#allocation5 + $0x74] ss:$8 sps:$4 sm:$0xff]   ;;  %v1916_v17 = vld [vmem:[#allocation5 + $0x70] ss:$8 sps:$4 sm:$0xff]   ;;  %vm2296_vm0 = vmmov 0  }
  0x74   :  { %596 = vmatpush1.bf16.msra.mxu0 %v1898_v3  ;;  %v109_v14 = vpack.c.bf16 %v104_v13, %v104_v13  ;;  %v1917_v18 = vld [vmem:[#allocation5 + $0x84] ss:$8 sps:$4 sm:$0xff]   ;;  %v1919_v19 = vld [vmem:[#allocation5 + $0x80] ss:$8 sps:$4 sm:$0xff]   ;;  %v1920_v20 = vld [vmem:[#allocation5 + $0x94] ss:$8 sps:$4 sm:$0xff]  }
  0x75   :  { %597 = vmatprep.subr.bf16.mxu0 %v1899_v4  ;;  %v1922_v21 = vld [vmem:[#allocation5 + $0x90] ss:$8 sps:$4 sm:$0xff]   ;;  %v1923_v22 = vld [vmem:[#allocation5 + $0xa4] ss:$8 sps:$4 sm:$0xff]   ;;  %v1925_v23 = vld [vmem:[#allocation5 + $0xa0] ss:$8 sps:$4 sm:$0xff]  }
  0x76   :  { %625 = vmatprep.mubr.bf16.mxu0 %v109_v14  ;;  %v1926_v24 = vld [vmem:[#allocation5 + $0xb4] ss:$8 sps:$4 sm:$0xff]   ;;  %v1928_v25 = vld [vmem:[#allocation5 + $0xb0] ss:$8 sps:$4 sm:$0xff]   ;;  %v1929_v26 = vld [vmem:[#allocation5 + $0xc4] ss:$8 sps:$4 sm:$0xff]  }
  0x77   :  { %v1931_v27 = vld [vmem:[#allocation5 + $0xc0] ss:$8 sps:$4 sm:$0xff]   ;;  %v1932_v28 = vld [vmem:[#allocation5 + $0xd4] ss:$8 sps:$4 sm:$0xff]   ;;  %v1934_v29 = vld [vmem:[#allocation5 + $0xd0] ss:$8 sps:$4 sm:$0xff]  }
  0x78   :  { %598 = vmatpush1.bf16.msra.mxu0 %v1901_v5  ;;  %v1935_v30 = vld [vmem:[#allocation5 + $0xe4] ss:$8 sps:$4 sm:$0xff]   ;;  %v1937_v31 = vld [vmem:[#allocation5 + $0xe0] ss:$8 sps:$4 sm:$0xff]   ;;  %v1938_v32 = vld [vmem:[#allocation5 + $0xf4] ss:$8 sps:$4 sm:$0xff]  }
  0x79   :  { %599 = vmatprep.subr.bf16.mxu0 %v1902_v6  ;;  %v1940_v33 = vld [vmem:[#allocation5 + $0xf0] ss:$8 sps:$4 sm:$0xff]   ;;  %v1943_v35 = vld [vmem:[#allocation5 + $0x104] ss:$8 sps:$4 sm:$0xff]   ;;  %v1941_v37 = vld [vmem:[#allocation5 + $0x100] ss:$8 sps:$4 sm:$0xff]  }
  0x7a   :  { %v103_v34 = vld [vmem:[#allocation2] sm:$0xff]  ;;  %v106_v36 = vld [vmem:[#allocation2 + $0x18] sm:$0xff]  ;;  %v1949_v42 = vld [vmem:[#allocation5 + $0x124] ss:$8 sps:$4 sm:$0xff]   ;;  %s2297_s5 = smov [#allocation13]  }
  0x7b   :  { %v108_v38 = vpack.c.bf16 %v103_v34, %v103_v34  ;;  %v1946_v39 = vld [vmem:[#allocation5 + $0x114] ss:$8 sps:$4 sm:$0xff]   ;;  %v111_v40 = vpack.c.bf16 %v106_v36, %v106_v36  ;;  %v1944_v41 = vld [vmem:[#allocation5 + $0x110] ss:$8 sps:$4 sm:$0xff]   ;;  %v1947_v43 = vld [vmem:[#allocation5 + $0x120] ss:$8 sps:$4 sm:$0xff]  }
  0x7c   :  { %600 = vmatpush1.bf16.msra.mxu0 %v1904_v7  ;;  %v1952_v44 = vld [vmem:[#allocation5 + $0x134] ss:$8 sps:$4 sm:$0xff]   ;;  %v1950_v45 = vld [vmem:[#allocation5 + $0x130] ss:$8 sps:$4 sm:$0xff]   ;;  %v1955_v46 = vld [vmem:[#allocation5 + $0x144] ss:$8 sps:$4 sm:$0xff]  }
  0x7d   :  { %601 = vmatprep.subr.bf16.mxu0 %v1905_v8  ;;  %v1953_v47 = vld [vmem:[#allocation5 + $0x140] ss:$8 sps:$4 sm:$0xff]   ;;  %v1958_v48 = vld [vmem:[#allocation5 + $0x154] ss:$8 sps:$4 sm:$0xff]   ;;  %v1956_v49 = vld [vmem:[#allocation5 + $0x150] ss:$8 sps:$4 sm:$0xff]  }
  0x7e   :  { %v1961_v50 = vld [vmem:[#allocation5 + $0x164] ss:$8 sps:$4 sm:$0xff]   ;;  %v1959_v51 = vld [vmem:[#allocation5 + $0x160] ss:$8 sps:$4 sm:$0xff]   ;;  %v1964_v52 = vld [vmem:[#allocation5 + $0x174] ss:$8 sps:$4 sm:$0xff]  }
  0x7f   :  { %v1962_v53 = vld [vmem:[#allocation5 + $0x170] ss:$8 sps:$4 sm:$0xff]   ;;  %v1967_v54 = vld [vmem:[#allocation5 + $0x184] ss:$8 sps:$4 sm:$0xff]   ;;  %v1965_v55 = vld [vmem:[#allocation5 + $0x180] ss:$8 sps:$4 sm:$0xff]  }
  0x80   :  { %602 = vmatpush1.bf16.msra.mxu0 %v1907_v9  ;;  %v1970_v56 = vld [vmem:[#allocation5 + $0x194] ss:$8 sps:$4 sm:$0xff]   ;;  %v1968_v57 = vld [vmem:[#allocation5 + $0x190] ss:$8 sps:$4 sm:$0xff]   ;;  %v1973_v58 = vld [vmem:[#allocation5 + $0x1a4] ss:$8 sps:$4 sm:$0xff]  }
  0x81   :  { %603 = vmatprep.subr.bf16.mxu0 %v1908_v10  ;;  %v1971_v59 = vld [vmem:[#allocation5 + $0x1a0] ss:$8 sps:$4 sm:$0xff]   ;;  %v1976_v60 = vld [vmem:[#allocation5 + $0x1b4] ss:$8 sps:$4 sm:$0xff]   ;;  %v1974_v61 = vld [vmem:[#allocation5 + $0x1b0] ss:$8 sps:$4 sm:$0xff]  }
  0x82   :  { %v1979_v62 = vld [vmem:[#allocation5 + $0x1c4] ss:$8 sps:$4 sm:$0xff]   ;;  %v1977_v63 = vld [vmem:[#allocation5 + $0x1c0] ss:$8 sps:$4 sm:$0xff]   ;;  %v1982_v0 = vld [vmem:[#allocation5 + $0x1d4] ss:$8 sps:$4 sm:$0xff]  }
  0x83   :  { %v1980_v1 = vld [vmem:[#allocation5 + $0x1d0] ss:$8 sps:$4 sm:$0xff]   ;;  %v1985_v2 = vld [vmem:[#allocation5 + $0x1e4] ss:$8 sps:$4 sm:$0xff]   ;;  %v1983_v3 = vld [vmem:[#allocation5 + $0x1e0] ss:$8 sps:$4 sm:$0xff]  }
  0x84   :  { %604 = vmatpush1.bf16.msra.mxu0 %v1910_v11  ;;  %v1988_v4 = vld [vmem:[#allocation5 + $0x1f4] ss:$8 sps:$4 sm:$0xff]   ;;  %v1986_v5 = vld [vmem:[#allocation5 + $0x1f0] ss:$8 sps:$4 sm:$0xff]   ;;  %v105_v6 = vld [vmem:[#allocation2 + $0x10] sm:$0xff]  ;;  %s1665_s21 = sshll.u32 %s2297_s5, 4  ;;  %s1666_s21 = int_to_ptr.vmem [resolvable:$true] %s1665_s21 }
  0x85   :  { %605 = vmatprep.subr.bf16.mxu0 %v1911_v12  ;;  %v1991_v7 = vld [vmem:[#allocation5 + $0x204] ss:$8 sps:$4 sm:$0xff]   ;;  %v110_v8 = vpack.c.bf16 %v105_v6, %v105_v6  ;;  %v1989_v9 = vld [vmem:[#allocation5 + $0x200] ss:$8 sps:$4 sm:$0xff]   ;;  %v1994_v10 = vld [vmem:[#allocation5 + $0x214] ss:$8 sps:$4 sm:$0xff]   ;;  %p2254_p7 = scmp.lt.s32.totalorder %s1666_s21, %s1666_s21 }
  0x86   :  { %v1992_v11 = vld [vmem:[#allocation5 + $0x210] ss:$8 sps:$4 sm:$0xff]   ;;  %v2293_v12 = vmov 0   ;;  %v1997_v13 = vld [vmem:[#allocation5 + $0x224] ss:$8 sps:$4 sm:$0xff]   ;;  %s2249_s1 = scalar_lea.vmem %s1666_s21, 512 }
  0x87   :  { %v1995_v14 = vld [vmem:[#allocation5 + $0x220] ss:$8 sps:$4 sm:$0xff]   ;;  %v2020_v34 = vld [vmem:[#allocation7 + $0x18] sm:$0xff]   ;;  %p2250_p6 = scmp.ne.s32.totalorder %s1666_s21, %s2249_s1  ;;  %p2255_p8 = scmp.lt.s32.totalorder %s2249_s1, %s2249_s1 }
  0x88   :  { %606 = vmatpush1.bf16.msra.mxu0 %v1913_v15  ;;  %v2000_v15 = vld [vmem:[#allocation5 + $0x234] ss:$8 sps:$4 sm:$0xff]   ;;  %v2022_v36 = vld [vmem:[#allocation7 + $0x20] sm:$0xff]  }
  0x89   :  { %607 = vmatprep.subr.bf16.mxu0 %v1914_v16  ;;  %v1998_v16 = vld [vmem:[#allocation5 + $0x230] ss:$8 sps:$4 sm:$0xff]   ;;  %p2256_p9 = por %p2255_p8, %p2254_p7 }
  0x8b   :  { %p2257_p10 = pnand %p2256_p9, %p2250_p6 }
  0x8c   :  { %608 = vmatpush1.bf16.msra.mxu0 %v1916_v17  ;;  %v2003_v17 = vld [vmem:[#allocation5 + $0x244] ss:$8 sps:$4 sm:$0xff]  }
  0x8d   :  { %609 = vmatprep.subr.bf16.mxu0 %v1917_v18  ;;  %v2001_v18 = vld [vmem:[#allocation5 + $0x240] ss:$8 sps:$4 sm:$0xff]  }
  0x90   :  { %610 = vmatpush1.bf16.msra.mxu0 %v1919_v19  ;;  %v2006_v19 = vld [vmem:[#allocation5 + $0x254] ss:$8 sps:$4 sm:$0xff]  }
  0x91   :  { %611 = vmatprep.subr.bf16.mxu0 %v1920_v20  ;;  %v2004_v20 = vld [vmem:[#allocation5 + $0x250] ss:$8 sps:$4 sm:$0xff]  }
  0x94   :  { %612 = vmatpush1.bf16.msra.mxu0 %v1922_v21  ;;  %v2009_v21 = vld [vmem:[#allocation5 + $0x264] ss:$8 sps:$4 sm:$0xff]  }
  0x95   :  { %613 = vmatprep.subr.bf16.mxu0 %v1923_v22  ;;  %v2007_v22 = vld [vmem:[#allocation5 + $0x260] ss:$8 sps:$4 sm:$0xff]  }
  0x98   :  { %614 = vmatpush1.bf16.msra.mxu0 %v1925_v23  ;;  %v2012_v23 = vld [vmem:[#allocation5 + $0x274] ss:$8 sps:$4 sm:$0xff]  }
  0x99   :  { %615 = vmatprep.subr.bf16.mxu0 %v1926_v24  ;;  %v2010_v24 = vld [vmem:[#allocation5 + $0x270] ss:$8 sps:$4 sm:$0xff]  }
  0x9c   :  { %616 = vmatpush1.bf16.msra.mxu0 %v1928_v25  ;;  %v107_v25 = vld [vmem:[#allocation2 + $0x20] sm:$0xff] }
  0x9d   :  { %617 = vmatprep.subr.bf16.mxu0 %v1929_v26  ;;  %v112_v26 = vpack.c.bf16 %v107_v25, %v107_v25 }
  0xa0   :  { %618 = vmatpush1.bf16.msra.mxu0 %v1931_v27  ;;  %v2013_v27 = vld [vmem:[#allocation7 + $0x40] sm:$0xff]  }
  0xa1   :  { %619 = vmatprep.subr.bf16.mxu0 %v1932_v28  ;;  %v2014_v28 = vld [vmem:[#allocation7] sm:$0xff]   ;;  %1817 = vmatprep.subr.bf16.mxu1 %v2013_v27 }
  0xa2   :  { %1818 = vmatpush3.bf16.msra.mxu1 %v2014_v28 }
  0xa4   :  { %620 = vmatpush1.bf16.msra.mxu0 %v1934_v29  ;;  %v2015_v29 = vld [vmem:[#allocation7 + $0x48] sm:$0xff]  }
  0xa5   :  { %621 = vmatprep.subr.bf16.mxu0 %v1935_v30  ;;  %v2016_v30 = vld [vmem:[#allocation7 + $0x8] sm:$0xff]   ;;  %1819 = vmatprep.subr.bf16.mxu1 %v2015_v29 }
  0xa6   :  { %1820 = vmatpush3.bf16.msra.mxu1 %v2016_v30 }
  0xa8   :  { %622 = vmatpush1.bf16.msra.mxu0 %v1937_v31  ;;  %v2017_v31 = vld [vmem:[#allocation7 + $0x50] sm:$0xff]  }
  0xa9   :  { %623 = vmatprep.subr.bf16.mxu0 %v1938_v32  ;;  %v2018_v32 = vld [vmem:[#allocation7 + $0x10] sm:$0xff]   ;;  %1821 = vmatprep.subr.bf16.mxu1 %v2017_v31 }
  0xaa   :  { %1822 = vmatpush3.bf16.msra.mxu1 %v2018_v32  ;;  %v716_v32 = vld [vmem:[#allocation11] ss:$8 sm:$0x3] }
  0xac   :  { %624 = vmatpush1.bf16.msra.mxu0 %v1940_v33  ;;  %v2019_v33 = vld [vmem:[#allocation7 + $0x58] sm:$0xff]  }
  0xad   :  { %634 = vmatprep.subr.bf16.mxu0 %v1943_v35  ;;  %1823 = vmatprep.subr.bf16.mxu1 %v2019_v33  ;;  %v2021_v35 = vld [vmem:[#allocation7 + $0x60] sm:$0xff]  }
  0xae   :  { %1824 = vmatpush3.bf16.msra.mxu1 %v2020_v34 }
  0xaf   :  { %626 = vmatmul.mubr.bf16.vlgmr.msra.gmra.mrb[0].mxu0 %v108_v38  ;;  %1825 = vmatprep.subr.bf16.mxu1 %v2021_v35  ;;  %v2024_v38 = vld [vmem:[#allocation7 + $0x28] sm:$0xff]  }
  0xb0   :  { %635 = vmatpush1.bf16.msra.mxu0 %v1941_v37  ;;  %666 = vmatprep.mubr.bf16.mxu0 %v111_v40  ;;  %v2023_v37 = vld [vmem:[#allocation7 + $0x68] sm:$0xff]   ;;  %v2026_v40 = vld [vmem:[#allocation7 + $0x30] sm:$0xff]  }
  0xb1   :  { %636 = vmatprep.subr.bf16.mxu0 %v1946_v39  ;;  %v2025_v39 = vld [vmem:[#allocation7 + $0x70] sm:$0xff]  }
  0xb2   :  { %1826 = vmatpush3.bf16.msra.mxu1 %v2022_v36 }
  0xb3   :  { %1827 = vmatprep.subr.bf16.mxu1 %v2023_v37 }
  0xb4   :  { %637 = vmatpush1.bf16.msra.mxu0 %v1944_v41  ;;  %v2027_v41 = vld [vmem:[#allocation7 + $0x78] sm:$0xff]  }
  0xb5   :  { %638 = vmatprep.subr.bf16.mxu0 %v1949_v42  ;;  %v2028_v42 = vld [vmem:[#allocation7 + $0x38] sm:$0xff]  }
  0xb6   :  { %1828 = vmatpush3.bf16.msra.mxu1 %v2024_v38 }
  0xb7   :  { %1829 = vmatprep.subr.bf16.mxu1 %v2025_v39 }
  0xb8   :  { %639 = vmatpush1.bf16.msra.mxu0 %v1947_v43 }
  0xb9   :  { %640 = vmatprep.subr.bf16.mxu0 %v1952_v44 }
  0xba   :  { %1830 = vmatpush3.bf16.msra.mxu1 %v2026_v40 }
  0xbb   :  { %1831 = vmatprep.subr.bf16.mxu1 %v2027_v41 }
  0xbc   :  { %641 = vmatpush1.bf16.msra.mxu0 %v1950_v45 }
  0xbd   :  { %642 = vmatprep.subr.bf16.mxu0 %v1955_v46 }
  0xbe   :  { %1832 = vmatpush3.bf16.msra.mxu1 %v2028_v42 }
  0xc0   :  { %643 = vmatpush1.bf16.msra.mxu0 %v1953_v47 }
  0xc1   :  { %644 = vmatprep.subr.bf16.mxu0 %v1958_v48 }
  0xc4   :  { %645 = vmatpush1.bf16.msra.mxu0 %v1956_v49 }
  0xc5   :  { %646 = vmatprep.subr.bf16.mxu0 %v1961_v50 }
  0xc8   :  { %647 = vmatpush1.bf16.msra.mxu0 %v1959_v51 }
  0xc9   :  { %648 = vmatprep.subr.bf16.mxu0 %v1964_v52 }
  0xcc   :  { %649 = vmatpush1.bf16.msra.mxu0 %v1962_v53 }
  0xcd   :  { %650 = vmatprep.subr.bf16.mxu0 %v1967_v54 }
  0xd0   :  { %651 = vmatpush1.bf16.msra.mxu0 %v1965_v55 }
  0xd1   :  { %652 = vmatprep.subr.bf16.mxu0 %v1970_v56 }
  0xd4   :  { %653 = vmatpush1.bf16.msra.mxu0 %v1968_v57 }
  0xd5   :  { %654 = vmatprep.subr.bf16.mxu0 %v1973_v58 }
  0xd8   :  { %655 = vmatpush1.bf16.msra.mxu0 %v1971_v59 }
  0xd9   :  { %656 = vmatprep.subr.bf16.mxu0 %v1976_v60 }
  0xdc   :  { %657 = vmatpush1.bf16.msra.mxu0 %v1974_v61 }
  0xdd   :  { %658 = vmatprep.subr.bf16.mxu0 %v1979_v62 }
  0xe0   :  { %659 = vmatpush1.bf16.msra.mxu0 %v1977_v63 }
  0xe1   :  { %660 = vmatprep.subr.bf16.mxu0 %v1982_v0 }
  0xe4   :  { %661 = vmatpush1.bf16.msra.mxu0 %v1980_v1 }
  0xe5   :  { %662 = vmatprep.subr.bf16.mxu0 %v1985_v2 }
  0xe8   :  { %663 = vmatpush1.bf16.msra.mxu0 %v1983_v3 }
  0xe9   :  { %664 = vmatprep.subr.bf16.mxu0 %v1988_v4 }
  0xec   :  { %665 = vmatpush1.bf16.msra.mxu0 %v1986_v5 }
  0xed   :  { %675 = vmatprep.subr.bf16.mxu0 %v1991_v7 }
  0xef   :  { %667 = vmatmul.mubr.bf16.vlgmr.msra.gmra.mrb[0].mxu0 %v110_v8 }
  0xf0   :  { %676 = vmatpush1.bf16.msra.mxu0 %v1989_v9  ;;  %707 = vmatprep.mubr.bf16.mxu0 %v2293_v12 }
  0xf1   :  { %677 = vmatprep.subr.bf16.mxu0 %v1994_v10 }
  0xf4   :  { %678 = vmatpush1.bf16.msra.mxu0 %v1992_v11 }
  0xf5   :  { %679 = vmatprep.subr.bf16.mxu0 %v1997_v13 }
  0xf8   :  { %680 = vmatpush1.bf16.msra.mxu0 %v1995_v14 }
  0xf9   :  { %681 = vmatprep.subr.bf16.mxu0 %v2000_v15 }
  0xfc   :  { %682 = vmatpush1.bf16.msra.mxu0 %v1998_v16 }
  0xfd   :  { %683 = vmatprep.subr.bf16.mxu0 %v2003_v17 }
 0x100   :  { %684 = vmatpush1.bf16.msra.mxu0 %v2001_v18 }
 0x101   :  { %685 = vmatprep.subr.bf16.mxu0 %v2006_v19 }
 0x104   :  { %686 = vmatpush1.bf16.msra.mxu0 %v2004_v20 }
 0x105   :  { %687 = vmatprep.subr.bf16.mxu0 %v2009_v21 }
 0x108   :  { %688 = vmatpush1.bf16.msra.mxu0 %v2007_v22  ;;  %v2294_v22 = vmov 1966171168  }
 0x109   :  { %689 = vmatprep.subr.bf16.mxu0 %v2012_v23  ;;  %v763_v23 = vunpack.c.l.s4 %v2294_v22 }
 0x10b   :  { %v764_v25 = vunpack.c.0.s8 %v763_v23 }
 0x10c   :  { %690 = vmatpush1.bf16.msra.mxu0 %v2010_v24  ;;  %v765_v24 = vlaneseq }
 0x10f   :  { %708 = vmatmul.mubr.bf16.vlgmr.msra.gmra.mrb[0].mxu0 %v112_v26  ;;  %v2418_v26 = vshrl.u32 %v765_v24, 7 }
 0x111   :  { %v2421_v28 = vsub.s32 %v764_v25, %v2418_v26  ;;  %v2426_v34 = vsub.s32 0, %v2418_v26  ;;  %v2429_v35 = vsub.s32 1, %v2418_v26 }
 0x1e2   :  { %v2412_v43 = vpop.f32.mrb[0].mxu0 }
 0x1e3   :  { %v719_v44 = vrot.slane %v2412_v43, 4  ;;  %v731_v45 = vmul.f32 %v2412_v43, %v2412_v43  ;;  %v711_v46 = vpop.f32.mrb[1].mxu0 }
 0x1e4   :  { %v725_v47 = vrot.slane %v711_v46, 4  ;;  %v732_v48 = vmul.f32 %v711_v46, %v711_v46  ;;  %v713_v49 = vpop.f32.mrb[2].mxu0 }
 0x1e5   :  { %v720_v50 = vadd.f32 %v719_v44, %v2412_v43  ;;  %v733_v51 = vrot.slane %v731_v45, 4  ;;  %v714_v52 = vpop.f32.mrb[3].mxu0 }
 0x1e6   :  { %v726_v53 = vadd.f32 %v725_v47, %v711_v46  ;;  %v739_v54 = vrot.slane %v732_v48, 4  ;;  %v718_v47 = vld [vmem:[#allocation11 + $0x1] ss:$8 sm:$0x3] }
 0x1e7   :  { %v721_v55 = vrot.slane %v720_v50, 2  ;;  %v734_v56 = vadd.f32 %v733_v51, %v731_v45 }
 0x1e8   :  { %v727_v57 = vrot.slane %v726_v53, 2  ;;  %v740_v58 = vadd.f32 %v739_v54, %v732_v48 }
 0x1e9   :  { %v722_v59 = vadd.f32 %v721_v55, %v720_v50  ;;  %v735_v60 = vrot.slane %v734_v56, 2 }
 0x1ea   :  { %v728_v61 = vadd.f32 %v727_v57, %v726_v53  ;;  %v741_v62 = vrot.slane %v740_v58, 2 }
 0x1eb   :  { %v723_v63 = vrot.slane %v722_v59, 1  ;;  %v736_v0 = vadd.f32 %v735_v60, %v734_v56  ;;  %v2032_v60 = vld [vmem:[#allocation8 + $0x18] sm:$0xff]  }
 0x1ec   :  { %v729_v1 = vrot.slane %v728_v61, 1  ;;  %v742_v2 = vadd.f32 %v741_v62, %v740_v58  ;;  %v2030_v58 = vld [vmem:[#allocation8 + $0x8] sm:$0xff]  }
 0x1ed   :  { %v724_v3 = vadd.f32 %v723_v63, %v722_v59  ;;  %v737_v4 = vrot.slane %v736_v0, 1  ;;  %v2031_v59 = vld [vmem:[#allocation8 + $0x10] sm:$0xff]   ;;  %v2034_v62 = vld [vmem:[#allocation8 + $0x28] sm:$0xff]  }
 0x1ee   :  { %v743_v5 = vrot.slane %v742_v2, 1  ;;  %v730_v6 = vadd.f32 %v729_v1, %v728_v61  ;;  %v2033_v61 = vld [vmem:[#allocation8 + $0x20] sm:$0xff]   ;;  %v2035_v63 = vld [vmem:[#allocation8 + $0x30] sm:$0xff]  }
 0x1ef   :  { %v738_v7 = vadd.f32 %v737_v4, %v736_v0  ;;  %v745_v8 = vmul.f32 0.125, %v724_v3  ;;  %v2036_v0 = vld [vmem:[#allocation8 + $0x38] sm:$0xff]  }
 0x1f0   :  { %v744_v9 = vadd.f32 %v743_v5, %v742_v2  ;;  %v746_v10 = vmul.f32 0.125, %v730_v6 }
 0x1f1   :  { %v747_v11 = vmul.f32 0.125, %v738_v7  ;;  %v749_v13 = vmul.f32 %v745_v8, %v745_v8 }
 0x1f2   :  { %v748_v14 = vmul.f32 0.125, %v744_v9  ;;  %v750_v15 = vmul.f32 %v746_v10, %v746_v10 }
 0x1f3   :  { %v751_v16 = vsub.f32 %v747_v11, %v749_v13 }
 0x1f4   :  { %v752_v17 = vsub.f32 %v748_v14, %v750_v15 }
 0x1f5   :  { %v753_v18 = vmax.f32 %v751_v16, 0.0 }
 0x1f6   :  { %v754_v19 = vmax.f32 %v752_v17, 0.0 }
 0x1f7   :  { %v755_v20 = vadd.f32 1e-05, %v753_v18 }
 0x1f8   :  { %v756_v21 = vadd.f32 1e-05, %v754_v19 }
 0x1f9   :  { %2085 = vrsqrt.f32 %v755_v20 }
 0x1fa   :  { %2087 = vrsqrt.f32 %v756_v21 }
 0x203   :  { %v2086_v27 = vpop.eup %2085 }
 0x204   :  { %v2088_v29 = vpop.eup %2087 }
 0x205   :  { %v761_v30 = vcombine.low %v2086_v27, %v2088_v29  ;;  %v997_v27 = vld [vmem:[#allocation11 + $0x2] ss:$0 sm:$0xff] }
 0x207   :  { %v768_v31 = vrot.slane %v761_v30, %v2421_v28 }
 0x209   :  { %v775_v33 = vrot.slane %v768_v31, %v2421_v28  ;;  %v998_v31 = vld [vmem:[#allocation11 + $0x3] ss:$0 sm:$0xff] }
 0x20b   :  { %v777_v36 = vmul.f32 %v775_v33, %v716_v32 }
 0x20d   :  { %v782_v37 = vrot.slane %v777_v36, %v2426_v34  ;;  %v786_v38 = vrot.slane %v777_v36, %v2429_v35 }
 0x20f   :  { %v789_v39 = vmul.f32 %v782_v37, %v745_v8  ;;  %v790_v40 = vmul.f32 %v786_v38, %v746_v10  ;;  %v811_v41 = vmul.f32 %v786_v38, %v711_v46  ;;  %v810_v42 = vmul.f32 %v782_v37, %v2412_v43  ;;  %v2029_v43 = vld [vmem:[#allocation8] sm:$0xff]  }
 0x210   :  { %v2295_v46 = vmov 0.0  }
 0x211   :  { %v793_v44 = vcombine.low %v789_v39, %v790_v40  ;;  %1848 = vmatprep.subr.bf16.mxu1 %v2295_v46  ;;  %v2039_v40 = vld [vmem:[#allocation10 + $0x4] ss:$16 sps:$4 sm:$0xff]  }
 0x213   :  { %v800_v45 = vrot.slane %v793_v44, %v2421_v28  ;;  %v2040_v44 = vld [vmem:[#allocation10 + $0x20] ss:$16 sps:$4 sm:$0xff]  }
 0x215   :  { %v807_v48 = vrot.slane %v800_v45, %v2421_v28  ;;  %v2045_v45 = vld [vmem:[#allocation10 + $0x44] ss:$16 sps:$4 sm:$0xff]  }
 0x217   :  { %v809_v49 = vsub.f32 %v718_v47, %v807_v48  ;;  %v2043_v47 = vld [vmem:[#allocation10 + $0x40] ss:$16 sps:$4 sm:$0xff]   ;;  %v2048_v48 = vld [vmem:[#allocation10 + $0x64] ss:$16 sps:$4 sm:$0xff]  }
 0x219   :  { %v820_v50 = vrot.slane %v809_v49, %v2429_v35  ;;  %v816_v51 = vrot.slane %v809_v49, %v2426_v34  ;;  %v2046_v49 = vld [vmem:[#allocation10 + $0x60] ss:$16 sps:$4 sm:$0xff]  }
 0x21b   :  { %v824_v52 = vadd.f32 %v820_v50, %v811_v41  ;;  %v823_v53 = vadd.f32 %v816_v51, %v810_v42  ;;  %v2037_v41 = vld [vmem:[#allocation10] ss:$16 sps:$4 sm:$0xff]   ;;  %v2042_v42 = vld [vmem:[#allocation10 + $0x24] ss:$16 sps:$4 sm:$0xff]  }
 0x21c   :  { %v2051_v50 = vld [vmem:[#allocation10 + $0x84] ss:$16 sps:$4 sm:$0xff]   ;;  %v2049_v51 = vld [vmem:[#allocation10 + $0x80] ss:$16 sps:$4 sm:$0xff]  }
 0x21d   :  { %v826_v54 = vmax.f32 %v824_v52, 0.0  ;;  %v825_v55 = vmax.f32 %v823_v53, 0.0  ;;  %v2054_v52 = vld [vmem:[#allocation10 + $0xa4] ss:$16 sps:$4 sm:$0xff]   ;;  %v2052_v53 = vld [vmem:[#allocation10 + $0xa0] ss:$16 sps:$4 sm:$0xff]  }
 0x21f   :  { %v828_v56 = vpack.c.bf16 %v826_v54, %v826_v54  ;;  %v827_v57 = vpack.c.bf16 %v825_v55, %v825_v55  ;;  %v2057_v54 = vld [vmem:[#allocation10 + $0xc4] ss:$16 sps:$4 sm:$0xff]   ;;  %v2055_v55 = vld [vmem:[#allocation10 + $0xc0] ss:$16 sps:$4 sm:$0xff]  }
 0x221   :  { %989 = vmatprep.mubr.bf16.mxu1 %v828_v56  ;;  %v2060_v56 = vld [vmem:[#allocation10 + $0xe4] ss:$16 sps:$4 sm:$0xff]  }
 0x222   :  { %990 = vmatmul.mubr.bf16.vlgmr.msra.gmra.mrb[0].mxu1 %v827_v57  ;;  %v2058_v57 = vld [vmem:[#allocation10 + $0xe0] ss:$16 sps:$4 sm:$0xff]  }
 0x223   :  { %1849 = vmatpush3.bf16.msra.mxu1 %v2029_v43  ;;  %1864 = vmatprep.mubr.msk.bf16.mxu1 %vm2296_vm0, %v2295_v46  ;;  %v2063_v43 = vld [vmem:[#allocation10 + $0xc] ss:$16 sps:$4 sm:$0xff]  }
 0x224   :  { %1850 = vmatprep.subr.bf16.mxu1 %v2295_v46 }
 0x227   :  { %1851 = vmatpush3.bf16.msra.mxu1 %v2030_v58 }
 0x228   :  { %1852 = vmatprep.subr.bf16.mxu1 %v2295_v46 }
 0x22b   :  { %1853 = vmatpush3.bf16.msra.mxu1 %v2031_v59 }
 0x22c   :  { %1854 = vmatprep.subr.bf16.mxu1 %v2295_v46 }
 0x22f   :  { %1855 = vmatpush3.bf16.msra.mxu1 %v2032_v60 }
 0x230   :  { %1856 = vmatprep.subr.bf16.mxu1 %v2295_v46 }
 0x233   :  { %1857 = vmatpush3.bf16.msra.mxu1 %v2033_v61 }
 0x234   :  { %1858 = vmatprep.subr.bf16.mxu1 %v2295_v46 }
 0x237   :  { %1859 = vmatpush3.bf16.msra.mxu1 %v2034_v62 }
 0x238   :  { %1860 = vmatprep.subr.bf16.mxu1 %v2295_v46 }
 0x23b   :  { %1861 = vmatpush3.bf16.msra.mxu1 %v2035_v63 }
 0x23c   :  { %1862 = vmatprep.subr.bf16.mxu1 %v2295_v46 }
 0x23f   :  { %1863 = vmatpush3.bf16.msra.mxu1 %v2036_v0 }
 0x240   :  { %1351 = vmatprep.subr.bf16.mxu1 %v2039_v40  ;;  %v2078_v40 = vld [vmem:[#allocation10 + $0xac] ss:$16 sps:$4 sm:$0xff]  }
 0x2f5   :  { %v1833_v1 = vpop.f32.mrb[0].mxu1 }
 0x2f6   :  { %v1834_v2 = vpop.f32.mrb[1].mxu1 }
 0x2f7   :  { %v1835_v3 = vadd.f32 %v1834_v2, %v1833_v1  ;;  %v1836_v4 = vpop.f32.mrb[2].mxu1 }
 0x2f8   :  { %v1837_v5 = vpop.f32.mrb[3].mxu1 }
 0x2f9   :  { %v999_v6 = vrot.slane %v1835_v3, 4  ;;  %v1005_v7 = vmul.f32 %v1835_v3, %v1835_v3 }
 0x2fb   :  { %v1000_v8 = vadd.f32 %v1835_v3, %v999_v6  ;;  %v1006_v9 = vrot.slane %v1005_v7, 4 }
 0x2fd   :  { %v1001_v10 = vrot.slane %v1000_v8, 2  ;;  %v1007_v11 = vadd.f32 %v1006_v9, %v1005_v7 }
 0x2ff   :  { %v1002_v13 = vadd.f32 %v1001_v10, %v1000_v8  ;;  %v1008_v14 = vrot.slane %v1007_v11, 2 }
 0x301   :  { %v1003_v15 = vrot.slane %v1002_v13, 1  ;;  %v1009_v16 = vadd.f32 %v1008_v14, %v1007_v11 }
 0x303   :  { %v1004_v17 = vadd.f32 %v1003_v15, %v1002_v13  ;;  %v1010_v18 = vrot.slane %v1009_v16, 1 }
 0x305   :  { %v1011_v19 = vadd.f32 %v1010_v18, %v1009_v16  ;;  %v1012_v20 = vmul.f32 0.125, %v1004_v17  ;;  %v1130_v17 = vld [vmem:[#allocation11 + $0x4] ss:$0 sm:$0xff] }
 0x307   :  { %v1013_v21 = vmul.f32 0.125, %v1011_v19  ;;  %v1014_v22 = vmul.f32 %v1012_v20, %v1012_v20 }
 0x309   :  { %v1015_v23 = vsub.f32 %v1013_v21, %v1014_v22 }
 0x30b   :  { %v1016_v24 = vmax.f32 %v1015_v23, 0.0 }
 0x30d   :  { %v1017_v25 = vadd.f32 1e-05, %v1016_v24 }
 0x30f   :  { %2089 = vrsqrt.f32 %v1017_v25 }
 0x319   :  { %v2090_v29 = vpop.eup %2089 }
 0x31a   :  { %v1019_v30 = vmul.f32 %v2090_v29, %v997_v27  ;;  %v2061_v27 = vld [vmem:[#allocation10 + $0x8] ss:$16 sps:$4 sm:$0xff]  }
 0x31c   :  { %v1020_v32 = vmul.f32 %v1019_v30, %v1012_v20  ;;  %v1022_v33 = vmul.f32 %v1835_v3, %v1019_v30  ;;  %v1131_v20 = vld [vmem:[#allocation11 + $0x5] ss:$0 sm:$0xff]  ;;  %v2066_v30 = vld [vmem:[#allocation10 + $0x2c] ss:$16 sps:$4 sm:$0xff]  }
 0x31e   :  { %v1021_v36 = vsub.f32 %v998_v31, %v1020_v32  ;;  %v2064_v31 = vld [vmem:[#allocation10 + $0x28] ss:$16 sps:$4 sm:$0xff]   ;;  %v2069_v32 = vld [vmem:[#allocation10 + $0x4c] ss:$16 sps:$4 sm:$0xff]  }
 0x320   :  { %v1023_v37 = vadd.f32 %v1022_v33, %v1021_v36  ;;  %v2067_v33 = vld [vmem:[#allocation10 + $0x48] ss:$16 sps:$4 sm:$0xff]   ;;  %v2072_v36 = vld [vmem:[#allocation10 + $0x6c] ss:$16 sps:$4 sm:$0xff]  }
 0x322   :  { %v1024_v38 = vmax.f32 %v1023_v37, 0.0  ;;  %v2070_v37 = vld [vmem:[#allocation10 + $0x68] ss:$16 sps:$4 sm:$0xff]  }
 0x324   :  { %v1025_v39 = vpack.c.bf16 %v1024_v38, %v1024_v38  ;;  %v2075_v38 = vld [vmem:[#allocation10 + $0x8c] ss:$16 sps:$4 sm:$0xff]  }
 0x326   :  { %1865 = vmatmul.mubr.bf16.vlgmr.msra.gmra.mrb[4].mxu1 %v1025_v39  ;;  %v2073_v39 = vld [vmem:[#allocation10 + $0x88] ss:$16 sps:$4 sm:$0xff]  }
 0x327   :  { %1383 = vmatprep.mubr.bf16.mxu1 %v2293_v12  ;;  %1352 = vmatpush1.bf16.msra.mxu1 %v2037_v41  ;;  %v2076_v41 = vld [vmem:[#allocation10 + $0xa8] ss:$16 sps:$4 sm:$0xff]  }
 0x328   :  { %1353 = vmatprep.subr.bf16.mxu1 %v2042_v42  ;;  %v2081_v42 = vld [vmem:[#allocation10 + $0xcc] ss:$16 sps:$4 sm:$0xff]  }
 0x32b   :  { %1354 = vmatpush1.bf16.msra.mxu1 %v2040_v44  ;;  %v2084_v44 = vld [vmem:[#allocation10 + $0xec] ss:$16 sps:$4 sm:$0xff]  }
 0x32c   :  { %1355 = vmatprep.subr.bf16.mxu1 %v2045_v45  ;;  %v2082_v45 = vld [vmem:[#allocation10 + $0xe8] ss:$16 sps:$4 sm:$0xff]  }
 0x32f   :  { %1356 = vmatpush1.bf16.msra.mxu1 %v2043_v47 }
 0x330   :  { %1357 = vmatprep.subr.bf16.mxu1 %v2048_v48 }
 0x333   :  { %1358 = vmatpush1.bf16.msra.mxu1 %v2046_v49 }
 0x334   :  { %1359 = vmatprep.subr.bf16.mxu1 %v2051_v50 }
 0x337   :  { %1360 = vmatpush1.bf16.msra.mxu1 %v2049_v51 }
 0x338   :  { %1361 = vmatprep.subr.bf16.mxu1 %v2054_v52 }
 0x33b   :  { %1362 = vmatpush1.bf16.msra.mxu1 %v2052_v53 }
 0x33c   :  { %1363 = vmatprep.subr.bf16.mxu1 %v2057_v54 }
 0x33f   :  { %1364 = vmatpush1.bf16.msra.mxu1 %v2055_v55 }
 0x340   :  { %1365 = vmatprep.subr.bf16.mxu1 %v2060_v56 }
 0x343   :  { %1366 = vmatpush1.bf16.msra.mxu1 %v2058_v57 }
 0x344   :  { %1392 = vmatprep.subr.bf16.mxu1 %v2063_v43 }
 0x3f9   :  { %v1124_v46 = vpop.f32.mrb[4].mxu1 }
 0x3fa   :  { %v1132_v58 = vrot.slane %v1124_v46, 4  ;;  %v1138_v59 = vmul.f32 %v1124_v46, %v1124_v46  ;;  %v1866_v60 = vpop.f32.mrb[5].mxu1 }
 0x3fb   :  { %v1127_v61 = vpop.f32.mrb[6].mxu1 }
 0x3fc   :  { %v1133_v62 = vadd.f32 %v1132_v58, %v1124_v46  ;;  %v1139_v63 = vrot.slane %v1138_v59, 4  ;;  %v1867_v0 = vpop.f32.mrb[7].mxu1 }
 0x3fe   :  { %v1134_v1 = vrot.slane %v1133_v62, 2  ;;  %v1140_v2 = vadd.f32 %v1139_v63, %v1138_v59 }
 0x400   :  { %v1135_v3 = vadd.f32 %v1134_v1, %v1133_v62  ;;  %v1141_v4 = vrot.slane %v1140_v2, 2 }
 0x402   :  { %v1136_v5 = vrot.slane %v1135_v3, 1  ;;  %v1142_v6 = vadd.f32 %v1141_v4, %v1140_v2 }
 0x404   :  { %v1137_v7 = vadd.f32 %v1136_v5, %v1135_v3  ;;  %v1143_v8 = vrot.slane %v1142_v6, 1 }
 0x406   :  { %v1144_v9 = vadd.f32 %v1143_v8, %v1142_v6  ;;  %v1145_v10 = vmul.f32 0.125, %v1137_v7 }
 0x408   :  { %v1146_v11 = vmul.f32 0.125, %v1144_v9  ;;  %v1147_v13 = vmul.f32 %v1145_v10, %v1145_v10 }
 0x40a   :  { %v1148_v14 = vsub.f32 %v1146_v11, %v1147_v13 }
 0x40c   :  { %v1149_v15 = vmax.f32 %v1148_v14, 0.0 }
 0x40e   :  { %v1150_v16 = vadd.f32 1e-05, %v1149_v15 }
 0x410   :  { %2091 = vrsqrt.f32 %v1150_v16 }
 0x41a   :  { %v2092_v18 = vpop.eup %2091 }
 0x41b   :  { %v1152_v19 = vmul.f32 %v2092_v18, %v1130_v17 }
 0x41d   :  { %v1153_v21 = vmul.f32 %v1152_v19, %v1145_v10  ;;  %v1155_v23 = vmul.f32 %v1152_v19, %v1124_v46 }
 0x41f   :  { %v1154_v22 = vsub.f32 %v1131_v20, %v1153_v21 }
 0x421   :  { %v1156_v24 = vadd.f32 %v1155_v23, %v1154_v22 }
 0x423   :  { %v1157_v25 = vmax.f32 %v1156_v24, 0.0 }
 0x425   :  { %v1158_v29 = vpack.c.bf16 %v1157_v25, %v1157_v25 }
 0x427   :  { %1384 = vmatmul.mubr.bf16.vlgmr.msra.gmra.mrb[8].mxu1 %v1158_v29 }
 0x428   :  { %1393 = vmatpush1.bf16.msra.mxu1 %v2061_v27  ;;  %1424 = vmatprep.mubr.bf16.mxu1 %v2293_v12  ;;  %v2079_v12 = vld [vmem:[#allocation10 + $0xc8] ss:$16 sps:$4 sm:$0xff]  }
 0x429   :  { %1394 = vmatprep.subr.bf16.mxu1 %v2066_v30 }
 0x42c   :  { %1395 = vmatpush1.bf16.msra.mxu1 %v2064_v31 }
 0x42d   :  { %1396 = vmatprep.subr.bf16.mxu1 %v2069_v32 }
 0x430   :  { %1397 = vmatpush1.bf16.msra.mxu1 %v2067_v33 }
 0x431   :  { %1398 = vmatprep.subr.bf16.mxu1 %v2072_v36 }
 0x434   :  { %1399 = vmatpush1.bf16.msra.mxu1 %v2070_v37 }
 0x435   :  { %1400 = vmatprep.subr.bf16.mxu1 %v2075_v38 }
 0x438   :  { %1401 = vmatpush1.bf16.msra.mxu1 %v2073_v39 }
 0x439   :  { %1402 = vmatprep.subr.bf16.mxu1 %v2078_v40 }
 0x43c   :  { %1403 = vmatpush1.bf16.msra.mxu1 %v2076_v41 }
 0x43d   :  { %1404 = vmatprep.subr.bf16.mxu1 %v2081_v42 }
 0x440   :  { %1405 = vmatpush1.bf16.msra.mxu1 %v2079_v12 }
 0x441   :  { %1406 = vmatprep.subr.bf16.mxu1 %v2084_v44 }
 0x444   :  { %1407 = vmatpush1.bf16.msra.mxu1 %v2082_v45 }
 0x447   :  { %1425 = vmatmul.mubr.bf16.vlgmr.msra.gmra.mrb[12].mxu1 %v1158_v29 }
 0x4fa   :  { %v2440_v47 = vpop.f32.mrb[8].mxu1 }
 0x4fb   :  { %v1437_v48 = vrot.slane %v2440_v47, 4  ;;  %v1461_v49 = vmul.f32 %v2440_v47, %v2440_v47  ;;  %v2445_v50 = vpop.f32.mrb[9].mxu1 }
 0x4fc   :  { %v1443_v51 = vrot.slane %v2445_v50, 4  ;;  %v1462_v52 = vmul.f32 %v2445_v50, %v2445_v50  ;;  %v1389_v53 = vpop.f32.mrb[10].mxu1 }
 0x4fd   :  { %v1438_v54 = vadd.f32 %v1437_v48, %v2440_v47  ;;  %v1465_v55 = vrot.slane %v1461_v49, 4  ;;  %v1390_v56 = vpop.f32.mrb[11].mxu1 }
 0x4fe   :  { %v1444_v57 = vadd.f32 %v1443_v51, %v2445_v50  ;;  %v1471_v43 = vrot.slane %v1462_v52, 4 }
 0x4ff   :  { %v1439_v46 = vrot.slane %v1438_v54, 2  ;;  %v1466_v58 = vadd.f32 %v1465_v55, %v1461_v49 }
 0x500   :  { %v1445_v59 = vrot.slane %v1444_v57, 2  ;;  %v1472_v60 = vadd.f32 %v1471_v43, %v1462_v52 }
 0x501   :  { %v1440_v61 = vadd.f32 %v1439_v46, %v1438_v54  ;;  %v1467_v62 = vrot.slane %v1466_v58, 2 }
 0x502   :  { %v1446_v63 = vadd.f32 %v1445_v59, %v1444_v57  ;;  %v1473_v0 = vrot.slane %v1472_v60, 2 }
 0x503   :  { %v1441_v1 = vrot.slane %v1440_v61, 1  ;;  %v1468_v2 = vadd.f32 %v1467_v62, %v1466_v58 }
 0x504   :  { %v1447_v3 = vrot.slane %v1446_v63, 1  ;;  %v1474_v4 = vadd.f32 %v1473_v0, %v1472_v60 }
 0x505   :  { %v1442_v5 = vadd.f32 %v1441_v1, %v1440_v61  ;;  %v1469_v6 = vrot.slane %v1468_v2, 1 }
 0x506   :  { %v1448_v7 = vadd.f32 %v1447_v3, %v1446_v63  ;;  %v1475_v8 = vrot.slane %v1474_v4, 1 }
 0x507   :  { %v1470_v9 = vadd.f32 %v1469_v6, %v1468_v2  ;;  %v2452_v10 = vmul.f32 0.125, %v1442_v5 }
 0x508   :  { %v1476_v11 = vadd.f32 %v1475_v8, %v1474_v4  ;;  %v2454_v13 = vmul.f32 0.125, %v1448_v7 }
 0x509   :  { %v1493_v14 = vmul.f32 0.125, %v1470_v9  ;;  %v1497_v15 = vmul.f32 %v2452_v10, %v2452_v10 }
 0x50a   :  { %v1494_v16 = vmul.f32 0.125, %v1476_v11  ;;  %v1498_v17 = vmul.f32 %v2454_v13, %v2454_v13 }
 0x50b   :  { %v1501_v18 = vsub.f32 %v1493_v14, %v1497_v15 }
 0x50c   :  { %v1502_v19 = vsub.f32 %v1494_v16, %v1498_v17 }
 0x50d   :  { %v1505_v20 = vmax.f32 %v1501_v18, 0.0 }
 0x50e   :  { %v1506_v21 = vmax.f32 %v1502_v19, 0.0  ;;  %v1434_v19 = vld [vmem:[#allocation11 + $0x6] ss:$8 sm:$0xf] }
 0x50f   :  { %v1509_v22 = vadd.f32 1e-05, %v1505_v20 }
 0x510   :  { %v1510_v23 = vadd.f32 1e-05, %v1506_v21  ;;  %v1558_v21 = vsub.s32 2, %v2418_v26 }
 0x511   :  { %2093 = vrsqrt.f32 %v1509_v22  ;;  %v1562_v22 = vsub.s32 3, %v2418_v26 }
 0x512   :  { %2095 = vrsqrt.f32 %v1510_v23 }
 0x51a   :  { %v2460_v24 = vpop.f32.mrb[12].mxu1 }
 0x51b   :  { %v2094_v25 = vpop.eup %2093  ;;  %v1449_v27 = vrot.slane %v2460_v24, 4  ;;  %v1463_v29 = vmul.f32 %v2460_v24, %v2460_v24  ;;  %v2465_v30 = vpop.f32.mrb[13].mxu1 }
 0x51c   :  { %v2096_v31 = vpop.eup %2095  ;;  %v1455_v32 = vrot.slane %v2465_v30, 4  ;;  %v1464_v33 = vmul.f32 %v2465_v30, %v2465_v30  ;;  %v1430_v36 = vpop.f32.mrb[14].mxu1 }
 0x51d   :  { %v1450_v37 = vadd.f32 %v1449_v27, %v2460_v24  ;;  %v1477_v38 = vrot.slane %v1463_v29, 4  ;;  %v1521_v39 = vcombine.low %v2094_v25, %v2096_v31  ;;  %v1431_v40 = vpop.f32.mrb[15].mxu1 }
 0x51e   :  { %v1456_v41 = vadd.f32 %v1455_v32, %v2465_v30  ;;  %v1483_v42 = vrot.slane %v1464_v33, 4 }
 0x51f   :  { %v1451_v12 = vrot.slane %v1450_v37, 2  ;;  %v1478_v44 = vadd.f32 %v1477_v38, %v1463_v29  ;;  %v1529_v16 = vrot.slane %v1521_v39, %v2421_v28 }
 0x520   :  { %v1457_v45 = vrot.slane %v1456_v41, 2  ;;  %v1484_v48 = vadd.f32 %v1483_v42, %v1464_v33 }
 0x521   :  { %v1452_v49 = vadd.f32 %v1451_v12, %v1450_v37  ;;  %v1479_v51 = vrot.slane %v1478_v44, 2 }
 0x522   :  { %v1458_v52 = vadd.f32 %v1457_v45, %v1456_v41  ;;  %v1485_v53 = vrot.slane %v1484_v48, 2 }
 0x523   :  { %v1453_v54 = vrot.slane %v1452_v49, 1  ;;  %v1480_v55 = vadd.f32 %v1479_v51, %v1478_v44 }
 0x524   :  { %v1459_v56 = vrot.slane %v1458_v52, 1  ;;  %v1486_v57 = vadd.f32 %v1485_v53, %v1484_v48 }
 0x525   :  { %v1454_v43 = vadd.f32 %v1453_v54, %v1452_v49  ;;  %v1481_v46 = vrot.slane %v1480_v55, 1 }
 0x526   :  { %v1460_v58 = vadd.f32 %v1459_v56, %v1458_v52  ;;  %v1487_v59 = vrot.slane %v1486_v57, 1 }
 0x527   :  { %v1482_v60 = vadd.f32 %v1481_v46, %v1480_v55  ;;  %v1491_v61 = vmul.f32 0.125, %v1454_v43 }
 0x528   :  { %v1488_v62 = vadd.f32 %v1487_v59, %v1486_v57  ;;  %v1492_v63 = vmul.f32 0.125, %v1460_v58 }
 0x529   :  { %v1495_v0 = vmul.f32 0.125, %v1482_v60  ;;  %v1499_v1 = vmul.f32 %v1491_v61, %v1491_v61 }
 0x52a   :  { %v1496_v2 = vmul.f32 0.125, %v1488_v62  ;;  %v1500_v3 = vmul.f32 %v1492_v63, %v1492_v63 }
 0x52b   :  { %v1503_v4 = vsub.f32 %v1495_v0, %v1499_v1 }
 0x52c   :  { %v1504_v5 = vsub.f32 %v1496_v2, %v1500_v3 }
 0x52d   :  { %v1507_v6 = vmax.f32 %v1503_v4, 0.0 }
 0x52e   :  { %v1508_v7 = vmax.f32 %v1504_v5, 0.0 }
 0x52f   :  { %v1511_v8 = vadd.f32 1e-05, %v1507_v6 }
 0x530   :  { %v1512_v9 = vadd.f32 1e-05, %v1508_v7 }
 0x531   :  { %2097 = vrsqrt.f32 %v1511_v8 }
 0x532   :  { %2099 = vrsqrt.f32 %v1512_v9 }
 0x53b   :  { %v2098_v11 = vpop.eup %2097 }
 0x53c   :  { %v2100_v14 = vpop.eup %2099 }
 0x53d   :  { %v1522_v15 = vcombine.low %v2098_v11, %v2100_v14 }
 0x53f   :  { %v1536_v17 = vrot.slane %v1522_v15, %v2421_v28 }
 0x541   :  { %v1537_v18 = vcombine.low %v1529_v16, %v1536_v17 }
 0x543   :  { %v1544_v20 = vrot.slane %v1537_v18, %v2421_v28 }
 0x545   :  { %v1546_v23 = vmul.f32 %v1544_v20, %v1434_v19 }
 0x547   :  { %v1551_v25 = vrot.slane %v1546_v23, %v2426_v34  ;;  %v1555_v27 = vrot.slane %v1546_v23, %v2429_v35  ;;  %v1559_v29 = vrot.slane %v1546_v23, %v1558_v21  ;;  %v1563_v31 = vrot.slane %v1546_v23, %v1562_v22 }
 0x549   :  { %v1568_v32 = vmul.f32 %v1551_v25, %v2452_v10  ;;  %v1569_v33 = vmul.f32 %v1555_v27, %v2454_v13  ;;  %v1570_v36 = vmul.f32 %v1559_v29, %v1491_v61  ;;  %v1571_v37 = vmul.f32 %v1563_v31, %v1492_v63  ;;  %v1436_v10 = vld [vmem:[#allocation11 + $0x7] ss:$8 sm:$0xf] }
 0x54a   :  { %v1604_v38 = vmul.f32 %v1559_v29, %v2460_v24  ;;  %v1605_v39 = vmul.f32 %v1563_v31, %v2465_v30  ;;  %v1602_v40 = vmul.f32 %v1551_v25, %v2440_v47  ;;  %v1603_v26 = vmul.f32 %v1555_v27, %v2445_v50 }
 0x54b   :  { %v1576_v41 = vcombine.low %v1568_v32, %v1569_v33  ;;  %v1577_v42 = vcombine.low %v1570_v36, %v1571_v37 }
 0x54d   :  { %v1584_v12 = vrot.slane %v1576_v41, %v2421_v28  ;;  %v1591_v44 = vrot.slane %v1577_v42, %v2421_v28 }
 0x54f   :  { %v1592_v45 = vcombine.low %v1584_v12, %v1591_v44 }
 0x551   :  { %v1599_v13 = vrot.slane %v1592_v45, %v2421_v28 }
 0x553   :  { %v1601_v48 = vsub.f32 %v1436_v10, %v1599_v13 }
 0x555   :  { %v1618_v49 = vrot.slane %v1601_v48, %v1558_v21  ;;  %v1622_v51 = vrot.slane %v1601_v48, %v1562_v22  ;;  %v1610_v24 = vrot.slane %v1601_v48, %v2426_v34  ;;  %v1614_v30 = vrot.slane %v1601_v48, %v2429_v35 }
 0x557   :  { %v1629_v47 = vadd.f32 %v1618_v49, %v1604_v38  ;;  %v1630_v52 = vadd.f32 %v1622_v51, %v1605_v39  ;;  %v1627_v50 = vadd.f32 %v1610_v24, %v1602_v40  ;;  %v1628_v53 = vadd.f32 %v1614_v30, %v1603_v26 }
 0x559   :  { %v1815_v54 = vmul.f32 -1.442695, %v1629_v47  ;;  %v1816_v55 = vmul.f32 -1.442695, %v1630_v52  ;;  %v1813_v56 = vmul.f32 -1.442695, %v1627_v50 }
 0x55a   :  { %v1814_v57 = vmul.f32 -1.442695, %v1628_v53 }
 0x55b   :  { %2101 = vpow2.f32 %v1815_v54 }
 0x55c   :  { %2103 = vpow2.f32 %v1816_v55 }
 0x55d   :  { %2105 = vpow2.f32 %v1813_v56 }
 0x55e   :  { %2107 = vpow2.f32 %v1814_v57 }
 0x565   :  { %v2102_v28 = vpop.eup %2101 }
 0x566   :  { %v2104_v43 = vpop.eup %2103  ;;  %v1645_v46 = vadd.f32 1.0, %v2102_v28 }
 0x567   :  { %v2106_v58 = vpop.eup %2105  ;;  %v1646_v59 = vadd.f32 1.0, %v2104_v43 }
 0x568   :  { %v2108_v34 = vpop.eup %2107  ;;  %v1643_v60 = vadd.f32 1.0, %v2106_v58  ;;  %2109 = vrcp.f32 %v1645_v46 }
 0x569   :  { %2111 = vrcp.f32 %v1646_v59  ;;  %v1644_v35 = vadd.f32 1.0, %v2108_v34 }
 0x56a   :  { %2113 = vrcp.f32 %v1643_v60 }
 0x56b   :  { %2115 = vrcp.f32 %v1644_v35 }
 0x572   :  { %v2110_v61 = vpop.eup %2109 }
 0x573   :  { %v2112_v62 = vpop.eup %2111  ;;  %1657 = vst [vmem:[#allocation13 + $0x10] sm:$0xff] %v2110_v61 }
 0x574   :  { %v2114_v63 = vpop.eup %2113  ;;  %1658 = vst [vmem:[#allocation13 + $0x18] sm:$0xff] %v2112_v62 }
 0x575   :  { %v2116_v0 = vpop.eup %2115  ;;  %1655 = vst [vmem:[#allocation13] sm:$0xff] %v2114_v63 }
 0x576   :  { %1656 = vst [vmem:[#allocation13 + $0x8] sm:$0xff] %v2116_v0 }
 0x577   :  { %2260 = shalt.err (!%p2257_p10)
}
 0x578   :  { %s2261_s24 = scalar_lea.hbm %s2508_s6, 512 }
 0x579   :  { %p2262_p11 = scmp.ne.s32.totalorder %s2508_s6, %s2261_s24  ;;  %p2265_p12 = scmp.lt.u32.totalorder %s2261_s24, %s2508_s6 }
 0x57b   :  { %p2267_p13 = pnand %p2265_p12, %p2262_p11 }
 0x57d   :  { %2270 = shalt.err (!%p2267_p13)
}
 0x57e   :  { %1668 = dma.vmem_to_hbm [thread:$0]  %s1666_s21, 512, %s2508_s6, [#allocation4]  }
 0x57f   :  { %2279 = dma.done.wait [#allocation4], 512  }
 0x580   :  { %2280 = vsyncadd [#allocation4], 4294966784 }
 0x581   :  { %1672 = vsyncpa [#allocation3], 1 }
 0x582   :  { %1673 = vsyncpa [#allocation6], 1 }
 0x583   :  { %1674 = vsyncpa [#allocation9], 1 }
 0x584   :  { %1675 = vsyncpa [#allocation12], 1 }
 0x585   :  { %1676 = vsyncpa [#allocation4], 1 }

</bundles_post_ra>
